<compile_context>
chip_gen: v7x
topology: tpu7x:2x2x1
jax: 0.10.0
libtpu: 0.0.40
codegen_flags: <defaults>
</compile_context>

<pallas_src>
import jax
import jax.numpy as jnp
from jax.experimental import pallas as pl
from jax.experimental.pallas import tpu as pltpu


# -----------------------------------------------------------------------------
# Fused kernel: one (batch-slice, time-chunk) grid step.
#   emb_ref : (T, Bs, E)  bf16   embedded tokens for this chunk (time-major)
#   wih_ref : (E, 4H)     bf16   W_ih^T              (constant block, no re-DMA)
#   bias_ref: (1, 4H)     f32    b_ih + b_hh         (constant block)
#   whh_ref : (H, 4H)     bf16   W_hh^T              (constant block)
#   out_ref : (T, Bs, H)  f32    per-step hidden outputs (time-major)
#   hN_ref  : (Bs, H)     f32    carried hidden state (also final output)
#   cN_ref  : (Bs, H)     f32    carried cell state   (also final output)
#   xg_ref  : (T, Bs, 4H) f32    VMEM scratch: chunk's input projection (never HBM)
# -----------------------------------------------------------------------------
def lstm_fused_kernel(emb_ref, wih_ref, bias_ref, whh_ref,
                      out_ref, hN_ref, cN_ref, xg_ref):
    tc = pl.program_id(1)

    @pl.when(tc == 0)
    def _init():
        # PyTorch default: zero initial hidden / cell state (per batch slice).
        hN_ref[...] = jnp.zeros_like(hN_ref)
        cN_ref[...] = jnp.zeros_like(cN_ref)

    T, Bs, E = emb_ref.shape
    H = hN_ref.shape[-1]
    G4 = 4 * H

    # Chunk-wide input projection on the MXU; result stays in VMEM scratch.
    # (T*Bs rows keep the MXU busy even when B is small.)
    emb = emb_ref[...].reshape(T * Bs, E)
    xg = jnp.dot(emb, wih_ref[...], preferred_element_type=jnp.float32)
    xg_ref[...] = (xg + bias_ref[...]).reshape(T, Bs, G4)

    whh = whh_ref[...]
    h = hN_ref[...]
    c = cN_ref[...]

    # Sequential recurrence inside the chunk; T is a small static int -> full unroll.
    for t in range(T):
        gates = xg_ref[t] + jnp.dot(h.astype(whh.dtype), whh,
                                    preferred_element_type=jnp.float32)
        # PyTorch gate order: i, f, g, o (lane-aligned slices when H % 128 == 0).
        i_g = jax.nn.sigmoid(gates[:, 0 * H:1 * H])
        f_g = jax.nn.sigmoid(gates[:, 1 * H:2 * H])
        g_g = jnp.tanh(gates[:, 2 * H:3 * H])
        o_g = jax.nn.sigmoid(gates[:, 3 * H:4 * H])
        c = f_g * c + i_g * g_g
        h = o_g * jnp.tanh(c)
        out_ref[t] = h

    hN_ref[...] = h
    cN_ref[...] = c


def _pick_time_chunk(S, max_chunk=8):
    """Largest divisor of S that is <= max_chunk (amortizes per-grid-step overhead)."""
    for cand in range(min(S, max_chunk), 0, -1):
        if S % cand == 0:
            return cand
    return 1


def _vmem_capacity_bytes():
    """Generation-aware VMEM capacity (64 MiB on v7x, 128 MiB on v5e/v6e)."""
    try:
        info = pltpu.get_tpu_info()
        cap = getattr(info, "vmem_capacity_bytes", None)
        if cap:
            return int(cap)
    except Exception:
        pass
    return 64 << 20  # conservative fallback (v7x-sized)


def init_params(key, vocab_size, embedding_dim, hidden_dim, pad_idx=0,
                weight_dtype=jnp.bfloat16):
    """PyTorch-style init; weights prepped ONCE (transposed + low precision)."""
    ks = jax.random.split(key, 5)
    H, E, V = hidden_dim, embedding_dim, vocab_size
    k = 1.0 / (H ** 0.5)

    emb = jax.random.normal(ks[0], (V, E), jnp.float32)
    emb = emb.at[pad_idx].set(0.0)                               # padding_idx row zeroed

    w_ih = jax.random.uniform(ks[1], (4 * H, E), jnp.float32, -k, k)
    w_hh = jax.random.uniform(ks[2], (4 * H, H), jnp.float32, -k, k)
    b_ih = jax.random.uniform(ks[3], (4 * H,), jnp.float32, -k, k)
    b_hh = jax.random.uniform(ks[4], (4 * H,), jnp.float32, -k, k)

    return {
        "embedding": emb.astype(weight_dtype),                   # (V, E)  bf16 table
        "wih_t": w_ih.T.astype(weight_dtype),                    # (E, 4H) bf16
        "whh_t": w_hh.T.astype(weight_dtype),                    # (H, 4H) bf16
        "bias": (b_ih + b_hh).reshape(1, 4 * H),                 # (1, 4H) f32
    }


@jax.jit
def encoder_lstm_forward(params, src):
    """Mirrors EncoderLSTM.forward (eval mode): returns (outputs, hidden, cell)."""
    B, S = src.shape
    E = params["embedding"].shape[1]
    H = params["whh_t"].shape[0]
    G4 = 4 * H

    # Pad batch to a multiple of 8 (sublane fill).  Pad token 0 == <pad>, whose
    # embedding row is zero; padded rows are sliced away at the end.
    B_pad = max(8, ((B + 7) // 8) * 8)
    if B_pad != B:
        src = jnp.pad(src, ((0, B_pad - B), (0, 0)))

    # Split the batch across a leading "parallel" grid axis when each slice still
    # fills >= 8 sublanes (uses v7x's 2nd TensorCore; harmless on v5e/v6e).
    NB = 2 if B_pad % 16 == 0 else 1
    Bs = B_pad // NB

    T_CHUNK = _pick_time_chunk(S, max_chunk=8)

    # Embedding gather (tiny, data-dependent -> XLA glue) + dropout (identity in eval),
    # produced time-major and already bf16 so there is no extra conversion pass.
    emb_tm = params["embedding"][src.T]                          # (S, B_pad, E) bf16

    # ---------------- fused time-chunked LSTM kernel ------------------------
    vmem_cap = _vmem_capacity_bytes()
    blocks_bytes = (
        2 * T_CHUNK * Bs * E * 2            # emb block (double-buffered, bf16)
        + 2 * (E * G4 + H * G4) * 2         # weight blocks (bf16)
        + 2 * G4 * 4                        # bias block
        + 2 * T_CHUNK * Bs * H * 4          # output block
        + 2 * 2 * Bs * H * 4                # h, c accumulators
        + T_CHUNK * Bs * G4 * 4             # xg scratch
    )
    vmem_limit = int(min(max(2 * blocks_bytes + (8 << 20), 16 << 20),
                         0.8 * vmem_cap))

    cost = pl.CostEstimate(
        flops=2 * S * B_pad * G4 * (E + H) + 12 * S * B_pad * H,
        transcendentals=5 * S * B_pad * H,
        bytes_accessed=(S * B_pad * E * 2 + (E + H) * G4 * 2 + G4 * 4
                        + S * B_pad * H * 4 + 2 * B_pad * H * 4),
    )

    out_tm, h_n, c_n = pl.pallas_call(
        lstm_fused_kernel,
        out_shape=(
            jax.ShapeDtypeStruct((S, B_pad, H), jnp.float32),
            jax.ShapeDtypeStruct((B_pad, H), jnp.float32),
            jax.ShapeDtypeStruct((B_pad, H), jnp.float32),
        ),
        grid_spec=pltpu.PrefetchScalarGridSpec(
            num_scalar_prefetch=0,
            grid=(NB, S // T_CHUNK),
            in_specs=[
                pl.BlockSpec((T_CHUNK, Bs, E), lambda b, t: (t, b, 0)),
                pl.BlockSpec((E, G4), lambda b, t: (0, 0)),
                pl.BlockSpec((1, G4), lambda b, t: (0, 0)),
                pl.BlockSpec((H, G4), lambda b, t: (0, 0)),
            ],
            out_specs=[
                pl.BlockSpec((T_CHUNK, Bs, H), lambda b, t: (t, b, 0)),
                pl.BlockSpec((Bs, H), lambda b, t: (b, 0)),
                pl.BlockSpec((Bs, H), lambda b, t: (b, 0)),
            ],
            scratch_shapes=[pltpu.VMEM((T_CHUNK, Bs, G4), jnp.float32)],
        ),
        compiler_params=pltpu.CompilerParams(
            dimension_semantics=("parallel", "arbitrary"),
            vmem_limit_bytes=vmem_limit,
        ),
        cost_estimate=cost,
    )(emb_tm, params["wih_t"], params["bias"], params["whh_t"])

    # Back to PyTorch (batch_first) shapes, dropping the batch padding.
    # TODO(synk): a time-major consumer (e.g. the decoder) could skip this XLA transpose.
    outputs = out_tm.transpose(1, 0, 2)[:B]                      # (B, S, H)
    hidden = h_n[None, :B]                                       # (1, B, H)
    cell = c_n[None, :B]                                         # (1, B, H)
    return outputs, hidden, cell


if __name__ == "__main__":
    # Small shapes consistent with EncoderLSTM.forward.
    B, S = 2, 8
    hidden_dim = 32
    embedding_dim = 16
    vocab_size = 64

    key = jax.random.PRNGKey(0)
    k_par, k_src = jax.random.split(key, 2)

    params = init_params(k_par, vocab_size, embedding_dim, hidden_dim, pad_idx=0)
    src = jax.random.randint(k_src, (B, S), 0, vocab_size, dtype=jnp.int32)

    outputs, hidden, cell = encoder_lstm_forward(params, src)
    jax.block_until_ready((outputs, hidden, cell))

    assert outputs.shape == (B, S, hidden_dim)
    assert hidden.shape == (1, B, hidden_dim)
    assert cell.shape == (1, B, hidden_dim)
    assert bool(jnp.all(jnp.isfinite(outputs)))
    print("KERNEL_OK")
</pallas_src>

<mosaic_0001>
module attributes {stable_mosaic.version = 11 : i64} {
  func.func @lstm_fused_kernel(%arg0: i32, %arg1: i32, %arg2: memref<8x8x16xbf16, #tpu.memory_space<vmem>>, %arg3: memref<16x128xbf16, #tpu.memory_space<vmem>>, %arg4: memref<1x128xf32, #tpu.memory_space<vmem>>, %arg5: memref<32x128xbf16, #tpu.memory_space<vmem>>, %arg6: memref<8x8x32xf32, #tpu.memory_space<vmem>>, %arg7: memref<8x32xf32, #tpu.memory_space<vmem>>, %arg8: memref<8x32xf32, #tpu.memory_space<vmem>>, %arg9: memref<8x8x128xf32, #tpu.memory_space<vmem>>) attributes {dimension_semantics = [#tpu.dimension_semantics<parallel>, #tpu.dimension_semantics<arbitrary>], iteration_bounds = array<i64: 1, 1>, scalar_prefetch = 0 : i64, scratch_operands = 1 : i64, tpu.core_type = #tpu.core_type<tc>, window_params = [{transform_indices = @transform_0, window_bounds = array<i64: 8, 8, 16>}, {pipeline_mode = #tpu.pipeline_mode<synchronous>, transform_indices = @transform_1, window_bounds = array<i64: 16, 128>}, {pipeline_mode = #tpu.pipeline_mode<synchronous>, transform_indices = @transform_2, window_bounds = array<i64: 1, 128>}, {pipeline_mode = #tpu.pipeline_mode<synchronous>, transform_indices = @transform_3, window_bounds = array<i64: 32, 128>}, {transform_indices = @transform_4, window_bounds = array<i64: 8, 8, 32>}, {transform_indices = @transform_5, window_bounds = array<i64: 8, 32>}, {transform_indices = @transform_6, window_bounds = array<i64: 8, 32>}]} {
    %c0_i32 = arith.constant 0 : i32
    %0 = arith.cmpi eq, %arg1, %c0_i32 : i32
    %1 = arith.extui %0 : i1 to i32
    %c0_i32_0 = arith.constant 0 : i32
    %2 = arith.cmpi ne, %1, %c0_i32_0 : i32
    scf.if %2 {
      %cst_93 = arith.constant 0.000000e+00 : f32
      %281 = vector.broadcast %cst_93 : f32 to vector<8x32xf32>
      %c0_94 = arith.constant 0 : index
      %c0_95 = arith.constant 0 : index
      %282 = vector.load %arg7[%c0_94, %c0_95] : memref<8x32xf32, #tpu.memory_space<vmem>>, vector<8x32xf32>
      tpu.vector_store %arg7[%c0_94, %c0_95], %281 {strides = array<i32>} : memref<8x32xf32, #tpu.memory_space<vmem>>, vector<8x32xf32>,
      %cst_96 = arith.constant 0.000000e+00 : f32
      %283 = vector.broadcast %cst_96 : f32 to vector<8x32xf32>
      %c0_97 = arith.constant 0 : index
      %c0_98 = arith.constant 0 : index
      %284 = vector.load %arg8[%c0_97, %c0_98] : memref<8x32xf32, #tpu.memory_space<vmem>>, vector<8x32xf32>
      tpu.vector_store %arg8[%c0_97, %c0_98], %283 {strides = array<i32>} : memref<8x32xf32, #tpu.memory_space<vmem>>, vector<8x32xf32>,
    } else {
    }
    %c0 = arith.constant 0 : index
    %c0_1 = arith.constant 0 : index
    %c0_2 = arith.constant 0 : index
    %3 = vector.load %arg2[%c0, %c0_1, %c0_2] : memref<8x8x16xbf16, #tpu.memory_space<vmem>>, vector<8x8x16xbf16>
    %4 = vector.shape_cast %3 : vector<8x8x16xbf16> to vector<64x16xbf16>
    %c0_3 = arith.constant 0 : index
    %c0_4 = arith.constant 0 : index
    %5 = vector.load %arg3[%c0_3, %c0_4] : memref<16x128xbf16, #tpu.memory_space<vmem>>, vector<16x128xbf16>
    %cst = arith.constant dense<0.000000e+00> : vector<64x128xf32>
    %6 = tpu.matmul %4, %5, %cst {dimension_numbers = #tpu.dot_dimension_numbers<[1], [0], [0], [1], [0, 0, 1, 1], [], []>} : vector<64x16xbf16>, vector<16x128xbf16>, vector<64x128xf32> -> vector<64x128xf32>
    %c0_5 = arith.constant 0 : index
    %c0_6 = arith.constant 0 : index
    %7 = vector.load %arg4[%c0_5, %c0_6] : memref<1x128xf32, #tpu.memory_space<vmem>>, vector<1x128xf32>
    %8 = vector.broadcast %7 : vector<1x128xf32> to vector<64x128xf32>
    %9 = arith.addf %6, %8 : vector<64x128xf32>
    %10 = vector.shape_cast %9 : vector<64x128xf32> to vector<8x8x128xf32>
    %c0_7 = arith.constant 0 : index
    %c0_8 = arith.constant 0 : index
    %c0_9 = arith.constant 0 : index
    %11 = vector.load %arg9[%c0_7, %c0_8, %c0_9] : memref<8x8x128xf32, #tpu.memory_space<vmem>>, vector<8x8x128xf32>
    tpu.vector_store %arg9[%c0_7, %c0_8, %c0_9], %10 {strides = array<i32>} : memref<8x8x128xf32, #tpu.memory_space<vmem>>, vector<8x8x128xf32>,
    %c0_10 = arith.constant 0 : index
    %c0_11 = arith.constant 0 : index
    %12 = vector.load %arg5[%c0_10, %c0_11] : memref<32x128xbf16, #tpu.memory_space<vmem>>, vector<32x128xbf16>
    %c0_12 = arith.constant 0 : index
    %c0_13 = arith.constant 0 : index
    %13 = vector.load %arg7[%c0_12, %c0_13] : memref<8x32xf32, #tpu.memory_space<vmem>>, vector<8x32xf32>
    %c0_14 = arith.constant 0 : index
    %c0_15 = arith.constant 0 : index
    %14 = vector.load %arg8[%c0_14, %c0_15] : memref<8x32xf32, #tpu.memory_space<vmem>>, vector<8x32xf32>
    %c0_16 = arith.constant 0 : index
    %c0_17 = arith.constant 0 : index
    %c0_18 = arith.constant 0 : index
    %15 = vector.load %arg9[%c0_16, %c0_17, %c0_18] : memref<8x8x128xf32, #tpu.memory_space<vmem>>, vector<1x8x128xf32>
    %16 = vector.shape_cast %15 : vector<1x8x128xf32> to vector<8x128xf32>
    %17 = arith.truncf %13 : vector<8x32xf32> to vector<8x32xbf16>
    %cst_19 = arith.constant dense<0.000000e+00> : vector<8x128xf32>
    %18 = tpu.matmul %17, %12, %cst_19 {dimension_numbers = #tpu.dot_dimension_numbers<[1], [0], [0], [1], [0, 0, 1, 1], [], []>} : vector<8x32xbf16>, vector<32x128xbf16>, vector<8x128xf32> -> vector<8x128xf32>
    %19 = arith.addf %16, %18 : vector<8x128xf32>
    %20 = vector.extract_strided_slice %19 {offsets = [0, 0], sizes = [8, 32], strides = [1, 1]} : vector<8x128xf32> to vector<8x32xf32>
    %21 = arith.negf %20 : vector<8x32xf32>
    %22 = math.exp %21 : vector<8x32xf32>
    %cst_20 = arith.constant 1.000000e+00 : f32
    %23 = vector.broadcast %cst_20 : f32 to vector<8x32xf32>
    %24 = arith.addf %23, %22 : vector<8x32xf32>
    %25 = arith.divf %23, %24 : vector<8x32xf32>
    %26 = vector.extract_strided_slice %19 {offsets = [0, 32], sizes = [8, 32], strides = [1, 1]} : vector<8x128xf32> to vector<8x32xf32>
    %27 = arith.negf %26 : vector<8x32xf32>
    %28 = math.exp %27 : vector<8x32xf32>
    %cst_21 = arith.constant 1.000000e+00 : f32
    %29 = vector.broadcast %cst_21 : f32 to vector<8x32xf32>
    %30 = arith.addf %29, %28 : vector<8x32xf32>
    %31 = arith.divf %29, %30 : vector<8x32xf32>
    %32 = vector.extract_strided_slice %19 {offsets = [0, 64], sizes = [8, 32], strides = [1, 1]} : vector<8x128xf32> to vector<8x32xf32>
    %33 = math.tanh %32 : vector<8x32xf32>
    %34 = vector.extract_strided_slice %19 {offsets = [0, 96], sizes = [8, 32], strides = [1, 1]} : vector<8x128xf32> to vector<8x32xf32>
    %35 = arith.negf %34 : vector<8x32xf32>
    %36 = math.exp %35 : vector<8x32xf32>
    %cst_22 = arith.constant 1.000000e+00 : f32
    %37 = vector.broadcast %cst_22 : f32 to vector<8x32xf32>
    %38 = arith.addf %37, %36 : vector<8x32xf32>
    %39 = arith.divf %37, %38 : vector<8x32xf32>
    %40 = arith.mulf %31, %14 : vector<8x32xf32>
    %41 = arith.mulf %25, %33 : vector<8x32xf32>
    %42 = arith.addf %40, %41 : vector<8x32xf32>
    %43 = math.tanh %42 : vector<8x32xf32>
    %44 = arith.mulf %39, %43 : vector<8x32xf32>
    %c0_23 = arith.constant 0 : index
    %c0_24 = arith.constant 0 : index
    %c0_25 = arith.constant 0 : index
    %45 = vector.load %arg6[%c0_23, %c0_24, %c0_25] : memref<8x8x32xf32, #tpu.memory_space<vmem>>, vector<1x8x32xf32>
    %46 = vector.shape_cast %45 : vector<1x8x32xf32> to vector<8x32xf32>
    %47 = vector.shape_cast %44 : vector<8x32xf32> to vector<1x8x32xf32>
    tpu.vector_store %arg6[%c0_23, %c0_24, %c0_25], %47 {strides = array<i32>} : memref<8x8x32xf32, #tpu.memory_space<vmem>>, vector<1x8x32xf32>,
    %c1 = arith.constant 1 : index
    %c0_26 = arith.constant 0 : index
    %c0_27 = arith.constant 0 : index
    %48 = vector.load %arg9[%c1, %c0_26, %c0_27] : memref<8x8x128xf32, #tpu.memory_space<vmem>>, vector<1x8x128xf32>
    %49 = vector.shape_cast %48 : vector<1x8x128xf32> to vector<8x128xf32>
    %50 = arith.truncf %44 : vector<8x32xf32> to vector<8x32xbf16>
    %cst_28 = arith.constant dense<0.000000e+00> : vector<8x128xf32>
    %51 = tpu.matmul %50, %12, %cst_28 {dimension_numbers = #tpu.dot_dimension_numbers<[1], [0], [0], [1], [0, 0, 1, 1], [], []>} : vector<8x32xbf16>, vector<32x128xbf16>, vector<8x128xf32> -> vector<8x128xf32>
    %52 = arith.addf %49, %51 : vector<8x128xf32>
    %53 = vector.extract_strided_slice %52 {offsets = [0, 0], sizes = [8, 32], strides = [1, 1]} : vector<8x128xf32> to vector<8x32xf32>
    %54 = arith.negf %53 : vector<8x32xf32>
    %55 = math.exp %54 : vector<8x32xf32>
    %cst_29 = arith.constant 1.000000e+00 : f32
    %56 = vector.broadcast %cst_29 : f32 to vector<8x32xf32>
    %57 = arith.addf %56, %55 : vector<8x32xf32>
    %58 = arith.divf %56, %57 : vector<8x32xf32>
    %59 = vector.extract_strided_slice %52 {offsets = [0, 32], sizes = [8, 32], strides = [1, 1]} : vector<8x128xf32> to vector<8x32xf32>
    %60 = arith.negf %59 : vector<8x32xf32>
    %61 = math.exp %60 : vector<8x32xf32>
    %cst_30 = arith.constant 1.000000e+00 : f32
    %62 = vector.broadcast %cst_30 : f32 to vector<8x32xf32>
    %63 = arith.addf %62, %61 : vector<8x32xf32>
    %64 = arith.divf %62, %63 : vector<8x32xf32>
    %65 = vector.extract_strided_slice %52 {offsets = [0, 64], sizes = [8, 32], strides = [1, 1]} : vector<8x128xf32> to vector<8x32xf32>
    %66 = math.tanh %65 : vector<8x32xf32>
    %67 = vector.extract_strided_slice %52 {offsets = [0, 96], sizes = [8, 32], strides = [1, 1]} : vector<8x128xf32> to vector<8x32xf32>
    %68 = arith.negf %67 : vector<8x32xf32>
    %69 = math.exp %68 : vector<8x32xf32>
    %cst_31 = arith.constant 1.000000e+00 : f32
    %70 = vector.broadcast %cst_31 : f32 to vector<8x32xf32>
    %71 = arith.addf %70, %69 : vector<8x32xf32>
    %72 = arith.divf %70, %71 : vector<8x32xf32>
    %73 = arith.mulf %64, %42 : vector<8x32xf32>
    %74 = arith.mulf %58, %66 : vector<8x32xf32>
    %75 = arith.addf %73, %74 : vector<8x32xf32>
    %76 = math.tanh %75 : vector<8x32xf32>
    %77 = arith.mulf %72, %76 : vector<8x32xf32>
    %c1_32 = arith.constant 1 : index
    %c0_33 = arith.constant 0 : index
    %c0_34 = arith.constant 0 : index
    %78 = vector.load %arg6[%c1_32, %c0_33, %c0_34] : memref<8x8x32xf32, #tpu.memory_space<vmem>>, vector<1x8x32xf32>
    %79 = vector.shape_cast %78 : vector<1x8x32xf32> to vector<8x32xf32>
    %80 = vector.shape_cast %77 : vector<8x32xf32> to vector<1x8x32xf32>
    tpu.vector_store %arg6[%c1_32, %c0_33, %c0_34], %80 {strides = array<i32>} : memref<8x8x32xf32, #tpu.memory_space<vmem>>, vector<1x8x32xf32>,
    %c2 = arith.constant 2 : index
    %c0_35 = arith.constant 0 : index
    %c0_36 = arith.constant 0 : index
    %81 = vector.load %arg9[%c2, %c0_35, %c0_36] : memref<8x8x128xf32, #tpu.memory_space<vmem>>, vector<1x8x128xf32>
    %82 = vector.shape_cast %81 : vector<1x8x128xf32> to vector<8x128xf32>
    %83 = arith.truncf %77 : vector<8x32xf32> to vector<8x32xbf16>
    %cst_37 = arith.constant dense<0.000000e+00> : vector<8x128xf32>
    %84 = tpu.matmul %83, %12, %cst_37 {dimension_numbers = #tpu.dot_dimension_numbers<[1], [0], [0], [1], [0, 0, 1, 1], [], []>} : vector<8x32xbf16>, vector<32x128xbf16>, vector<8x128xf32> -> vector<8x128xf32>
    %85 = arith.addf %82, %84 : vector<8x128xf32>
    %86 = vector.extract_strided_slice %85 {offsets = [0, 0], sizes = [8, 32], strides = [1, 1]} : vector<8x128xf32> to vector<8x32xf32>
    %87 = arith.negf %86 : vector<8x32xf32>
    %88 = math.exp %87 : vector<8x32xf32>
    %cst_38 = arith.constant 1.000000e+00 : f32
    %89 = vector.broadcast %cst_38 : f32 to vector<8x32xf32>
    %90 = arith.addf %89, %88 : vector<8x32xf32>
    %91 = arith.divf %89, %90 : vector<8x32xf32>
    %92 = vector.extract_strided_slice %85 {offsets = [0, 32], sizes = [8, 32], strides = [1, 1]} : vector<8x128xf32> to vector<8x32xf32>
    %93 = arith.negf %92 : vector<8x32xf32>
    %94 = math.exp %93 : vector<8x32xf32>
    %cst_39 = arith.constant 1.000000e+00 : f32
    %95 = vector.broadcast %cst_39 : f32 to vector<8x32xf32>
    %96 = arith.addf %95, %94 : vector<8x32xf32>
    %97 = arith.divf %95, %96 : vector<8x32xf32>
    %98 = vector.extract_strided_slice %85 {offsets = [0, 64], sizes = [8, 32], strides = [1, 1]} : vector<8x128xf32> to vector<8x32xf32>
    %99 = math.tanh %98 : vector<8x32xf32>
    %100 = vector.extract_strided_slice %85 {offsets = [0, 96], sizes = [8, 32], strides = [1, 1]} : vector<8x128xf32> to vector<8x32xf32>
    %101 = arith.negf %100 : vector<8x32xf32>
    %102 = math.exp %101 : vector<8x32xf32>
    %cst_40 = arith.constant 1.000000e+00 : f32
    %103 = vector.broadcast %cst_40 : f32 to vector<8x32xf32>
    %104 = arith.addf %103, %102 : vector<8x32xf32>
    %105 = arith.divf %103, %104 : vector<8x32xf32>
    %106 = arith.mulf %97, %75 : vector<8x32xf32>
    %107 = arith.mulf %91, %99 : vector<8x32xf32>
    %108 = arith.addf %106, %107 : vector<8x32xf32>
    %109 = math.tanh %108 : vector<8x32xf32>
    %110 = arith.mulf %105, %109 : vector<8x32xf32>
    %c2_41 = arith.constant 2 : index
    %c0_42 = arith.constant 0 : index
    %c0_43 = arith.constant 0 : index
    %111 = vector.load %arg6[%c2_41, %c0_42, %c0_43] : memref<8x8x32xf32, #tpu.memory_space<vmem>>, vector<1x8x32xf32>
    %112 = vector.shape_cast %111 : vector<1x8x32xf32> to vector<8x32xf32>
    %113 = vector.shape_cast %110 : vector<8x32xf32> to vector<1x8x32xf32>
    tpu.vector_store %arg6[%c2_41, %c0_42, %c0_43], %113 {strides = array<i32>} : memref<8x8x32xf32, #tpu.memory_space<vmem>>, vector<1x8x32xf32>,
    %c3 = arith.constant 3 : index
    %c0_44 = arith.constant 0 : index
    %c0_45 = arith.constant 0 : index
    %114 = vector.load %arg9[%c3, %c0_44, %c0_45] : memref<8x8x128xf32, #tpu.memory_space<vmem>>, vector<1x8x128xf32>
    %115 = vector.shape_cast %114 : vector<1x8x128xf32> to vector<8x128xf32>
    %116 = arith.truncf %110 : vector<8x32xf32> to vector<8x32xbf16>
    %cst_46 = arith.constant dense<0.000000e+00> : vector<8x128xf32>
    %117 = tpu.matmul %116, %12, %cst_46 {dimension_numbers = #tpu.dot_dimension_numbers<[1], [0], [0], [1], [0, 0, 1, 1], [], []>} : vector<8x32xbf16>, vector<32x128xbf16>, vector<8x128xf32> -> vector<8x128xf32>
    %118 = arith.addf %115, %117 : vector<8x128xf32>
    %119 = vector.extract_strided_slice %118 {offsets = [0, 0], sizes = [8, 32], strides = [1, 1]} : vector<8x128xf32> to vector<8x32xf32>
    %120 = arith.negf %119 : vector<8x32xf32>
    %121 = math.exp %120 : vector<8x32xf32>
    %cst_47 = arith.constant 1.000000e+00 : f32
    %122 = vector.broadcast %cst_47 : f32 to vector<8x32xf32>
    %123 = arith.addf %122, %121 : vector<8x32xf32>
    %124 = arith.divf %122, %123 : vector<8x32xf32>
    %125 = vector.extract_strided_slice %118 {offsets = [0, 32], sizes = [8, 32], strides = [1, 1]} : vector<8x128xf32> to vector<8x32xf32>
    %126 = arith.negf %125 : vector<8x32xf32>
    %127 = math.exp %126 : vector<8x32xf32>
    %cst_48 = arith.constant 1.000000e+00 : f32
    %128 = vector.broadcast %cst_48 : f32 to vector<8x32xf32>
    %129 = arith.addf %128, %127 : vector<8x32xf32>
    %130 = arith.divf %128, %129 : vector<8x32xf32>
    %131 = vector.extract_strided_slice %118 {offsets = [0, 64], sizes = [8, 32], strides = [1, 1]} : vector<8x128xf32> to vector<8x32xf32>
    %132 = math.tanh %131 : vector<8x32xf32>
    %133 = vector.extract_strided_slice %118 {offsets = [0, 96], sizes = [8, 32], strides = [1, 1]} : vector<8x128xf32> to vector<8x32xf32>
    %134 = arith.negf %133 : vector<8x32xf32>
    %135 = math.exp %134 : vector<8x32xf32>
    %cst_49 = arith.constant 1.000000e+00 : f32
    %136 = vector.broadcast %cst_49 : f32 to vector<8x32xf32>
    %137 = arith.addf %136, %135 : vector<8x32xf32>
    %138 = arith.divf %136, %137 : vector<8x32xf32>
    %139 = arith.mulf %130, %108 : vector<8x32xf32>
    %140 = arith.mulf %124, %132 : vector<8x32xf32>
    %141 = arith.addf %139, %140 : vector<8x32xf32>
    %142 = math.tanh %141 : vector<8x32xf32>
    %143 = arith.mulf %138, %142 : vector<8x32xf32>
    %c3_50 = arith.constant 3 : index
    %c0_51 = arith.constant 0 : index
    %c0_52 = arith.constant 0 : index
    %144 = vector.load %arg6[%c3_50, %c0_51, %c0_52] : memref<8x8x32xf32, #tpu.memory_space<vmem>>, vector<1x8x32xf32>
    %145 = vector.shape_cast %144 : vector<1x8x32xf32> to vector<8x32xf32>
    %146 = vector.shape_cast %143 : vector<8x32xf32> to vector<1x8x32xf32>
    tpu.vector_store %arg6[%c3_50, %c0_51, %c0_52], %146 {strides = array<i32>} : memref<8x8x32xf32, #tpu.memory_space<vmem>>, vector<1x8x32xf32>,
    %c4 = arith.constant 4 : index
    %c0_53 = arith.constant 0 : index
    %c0_54 = arith.constant 0 : index
    %147 = vector.load %arg9[%c4, %c0_53, %c0_54] : memref<8x8x128xf32, #tpu.memory_space<vmem>>, vector<1x8x128xf32>
    %148 = vector.shape_cast %147 : vector<1x8x128xf32> to vector<8x128xf32>
    %149 = arith.truncf %143 : vector<8x32xf32> to vector<8x32xbf16>
    %cst_55 = arith.constant dense<0.000000e+00> : vector<8x128xf32>
    %150 = tpu.matmul %149, %12, %cst_55 {dimension_numbers = #tpu.dot_dimension_numbers<[1], [0], [0], [1], [0, 0, 1, 1], [], []>} : vector<8x32xbf16>, vector<32x128xbf16>, vector<8x128xf32> -> vector<8x128xf32>
    %151 = arith.addf %148, %150 : vector<8x128xf32>
    %152 = vector.extract_strided_slice %151 {offsets = [0, 0], sizes = [8, 32], strides = [1, 1]} : vector<8x128xf32> to vector<8x32xf32>
    %153 = arith.negf %152 : vector<8x32xf32>
    %154 = math.exp %153 : vector<8x32xf32>
    %cst_56 = arith.constant 1.000000e+00 : f32
    %155 = vector.broadcast %cst_56 : f32 to vector<8x32xf32>
    %156 = arith.addf %155, %154 : vector<8x32xf32>
    %157 = arith.divf %155, %156 : vector<8x32xf32>
    %158 = vector.extract_strided_slice %151 {offsets = [0, 32], sizes = [8, 32], strides = [1, 1]} : vector<8x128xf32> to vector<8x32xf32>
    %159 = arith.negf %158 : vector<8x32xf32>
    %160 = math.exp %159 : vector<8x32xf32>
    %cst_57 = arith.constant 1.000000e+00 : f32
    %161 = vector.broadcast %cst_57 : f32 to vector<8x32xf32>
    %162 = arith.addf %161, %160 : vector<8x32xf32>
    %163 = arith.divf %161, %162 : vector<8x32xf32>
    %164 = vector.extract_strided_slice %151 {offsets = [0, 64], sizes = [8, 32], strides = [1, 1]} : vector<8x128xf32> to vector<8x32xf32>
    %165 = math.tanh %164 : vector<8x32xf32>
    %166 = vector.extract_strided_slice %151 {offsets = [0, 96], sizes = [8, 32], strides = [1, 1]} : vector<8x128xf32> to vector<8x32xf32>
    %167 = arith.negf %166 : vector<8x32xf32>
    %168 = math.exp %167 : vector<8x32xf32>
    %cst_58 = arith.constant 1.000000e+00 : f32
    %169 = vector.broadcast %cst_58 : f32 to vector<8x32xf32>
    %170 = arith.addf %169, %168 : vector<8x32xf32>
    %171 = arith.divf %169, %170 : vector<8x32xf32>
    %172 = arith.mulf %163, %141 : vector<8x32xf32>
    %173 = arith.mulf %157, %165 : vector<8x32xf32>
    %174 = arith.addf %172, %173 : vector<8x32xf32>
    %175 = math.tanh %174 : vector<8x32xf32>
    %176 = arith.mulf %171, %175 : vector<8x32xf32>
    %c4_59 = arith.constant 4 : index
    %c0_60 = arith.constant 0 : index
    %c0_61 = arith.constant 0 : index
    %177 = vector.load %arg6[%c4_59, %c0_60, %c0_61] : memref<8x8x32xf32, #tpu.memory_space<vmem>>, vector<1x8x32xf32>
    %178 = vector.shape_cast %177 : vector<1x8x32xf32> to vector<8x32xf32>
    %179 = vector.shape_cast %176 : vector<8x32xf32> to vector<1x8x32xf32>
    tpu.vector_store %arg6[%c4_59, %c0_60, %c0_61], %179 {strides = array<i32>} : memref<8x8x32xf32, #tpu.memory_space<vmem>>, vector<1x8x32xf32>,
    %c5 = arith.constant 5 : index
    %c0_62 = arith.constant 0 : index
    %c0_63 = arith.constant 0 : index
    %180 = vector.load %arg9[%c5, %c0_62, %c0_63] : memref<8x8x128xf32, #tpu.memory_space<vmem>>, vector<1x8x128xf32>
    %181 = vector.shape_cast %180 : vector<1x8x128xf32> to vector<8x128xf32>
    %182 = arith.truncf %176 : vector<8x32xf32> to vector<8x32xbf16>
    %cst_64 = arith.constant dense<0.000000e+00> : vector<8x128xf32>
    %183 = tpu.matmul %182, %12, %cst_64 {dimension_numbers = #tpu.dot_dimension_numbers<[1], [0], [0], [1], [0, 0, 1, 1], [], []>} : vector<8x32xbf16>, vector<32x128xbf16>, vector<8x128xf32> -> vector<8x128xf32>
    %184 = arith.addf %181, %183 : vector<8x128xf32>
    %185 = vector.extract_strided_slice %184 {offsets = [0, 0], sizes = [8, 32], strides = [1, 1]} : vector<8x128xf32> to vector<8x32xf32>
    %186 = arith.negf %185 : vector<8x32xf32>
    %187 = math.exp %186 : vector<8x32xf32>
    %cst_65 = arith.constant 1.000000e+00 : f32
    %188 = vector.broadcast %cst_65 : f32 to vector<8x32xf32>
    %189 = arith.addf %188, %187 : vector<8x32xf32>
    %190 = arith.divf %188, %189 : vector<8x32xf32>
    %191 = vector.extract_strided_slice %184 {offsets = [0, 32], sizes = [8, 32], strides = [1, 1]} : vector<8x128xf32> to vector<8x32xf32>
    %192 = arith.negf %191 : vector<8x32xf32>
    %193 = math.exp %192 : vector<8x32xf32>
    %cst_66 = arith.constant 1.000000e+00 : f32
    %194 = vector.broadcast %cst_66 : f32 to vector<8x32xf32>
    %195 = arith.addf %194, %193 : vector<8x32xf32>
    %196 = arith.divf %194, %195 : vector<8x32xf32>
    %197 = vector.extract_strided_slice %184 {offsets = [0, 64], sizes = [8, 32], strides = [1, 1]} : vector<8x128xf32> to vector<8x32xf32>
    %198 = math.tanh %197 : vector<8x32xf32>
    %199 = vector.extract_strided_slice %184 {offsets = [0, 96], sizes = [8, 32], strides = [1, 1]} : vector<8x128xf32> to vector<8x32xf32>
    %200 = arith.negf %199 : vector<8x32xf32>
    %201 = math.exp %200 : vector<8x32xf32>
    %cst_67 = arith.constant 1.000000e+00 : f32
    %202 = vector.broadcast %cst_67 : f32 to vector<8x32xf32>
    %203 = arith.addf %202, %201 : vector<8x32xf32>
    %204 = arith.divf %202, %203 : vector<8x32xf32>
    %205 = arith.mulf %196, %174 : vector<8x32xf32>
    %206 = arith.mulf %190, %198 : vector<8x32xf32>
    %207 = arith.addf %205, %206 : vector<8x32xf32>
    %208 = math.tanh %207 : vector<8x32xf32>
    %209 = arith.mulf %204, %208 : vector<8x32xf32>
    %c5_68 = arith.constant 5 : index
    %c0_69 = arith.constant 0 : index
    %c0_70 = arith.constant 0 : index
    %210 = vector.load %arg6[%c5_68, %c0_69, %c0_70] : memref<8x8x32xf32, #tpu.memory_space<vmem>>, vector<1x8x32xf32>
    %211 = vector.shape_cast %210 : vector<1x8x32xf32> to vector<8x32xf32>
    %212 = vector.shape_cast %209 : vector<8x32xf32> to vector<1x8x32xf32>
    tpu.vector_store %arg6[%c5_68, %c0_69, %c0_70], %212 {strides = array<i32>} : memref<8x8x32xf32, #tpu.memory_space<vmem>>, vector<1x8x32xf32>,
    %c6 = arith.constant 6 : index
    %c0_71 = arith.constant 0 : index
    %c0_72 = arith.constant 0 : index
    %213 = vector.load %arg9[%c6, %c0_71, %c0_72] : memref<8x8x128xf32, #tpu.memory_space<vmem>>, vector<1x8x128xf32>
    %214 = vector.shape_cast %213 : vector<1x8x128xf32> to vector<8x128xf32>
    %215 = arith.truncf %209 : vector<8x32xf32> to vector<8x32xbf16>
    %cst_73 = arith.constant dense<0.000000e+00> : vector<8x128xf32>
    %216 = tpu.matmul %215, %12, %cst_73 {dimension_numbers = #tpu.dot_dimension_numbers<[1], [0], [0], [1], [0, 0, 1, 1], [], []>} : vector<8x32xbf16>, vector<32x128xbf16>, vector<8x128xf32> -> vector<8x128xf32>
    %217 = arith.addf %214, %216 : vector<8x128xf32>
    %218 = vector.extract_strided_slice %217 {offsets = [0, 0], sizes = [8, 32], strides = [1, 1]} : vector<8x128xf32> to vector<8x32xf32>
    %219 = arith.negf %218 : vector<8x32xf32>
    %220 = math.exp %219 : vector<8x32xf32>
    %cst_74 = arith.constant 1.000000e+00 : f32
    %221 = vector.broadcast %cst_74 : f32 to vector<8x32xf32>
    %222 = arith.addf %221, %220 : vector<8x32xf32>
    %223 = arith.divf %221, %222 : vector<8x32xf32>
    %224 = vector.extract_strided_slice %217 {offsets = [0, 32], sizes = [8, 32], strides = [1, 1]} : vector<8x128xf32> to vector<8x32xf32>
    %225 = arith.negf %224 : vector<8x32xf32>
    %226 = math.exp %225 : vector<8x32xf32>
    %cst_75 = arith.constant 1.000000e+00 : f32
    %227 = vector.broadcast %cst_75 : f32 to vector<8x32xf32>
    %228 = arith.addf %227, %226 : vector<8x32xf32>
    %229 = arith.divf %227, %228 : vector<8x32xf32>
    %230 = vector.extract_strided_slice %217 {offsets = [0, 64], sizes = [8, 32], strides = [1, 1]} : vector<8x128xf32> to vector<8x32xf32>
    %231 = math.tanh %230 : vector<8x32xf32>
    %232 = vector.extract_strided_slice %217 {offsets = [0, 96], sizes = [8, 32], strides = [1, 1]} : vector<8x128xf32> to vector<8x32xf32>
    %233 = arith.negf %232 : vector<8x32xf32>
    %234 = math.exp %233 : vector<8x32xf32>
    %cst_76 = arith.constant 1.000000e+00 : f32
    %235 = vector.broadcast %cst_76 : f32 to vector<8x32xf32>
    %236 = arith.addf %235, %234 : vector<8x32xf32>
    %237 = arith.divf %235, %236 : vector<8x32xf32>
    %238 = arith.mulf %229, %207 : vector<8x32xf32>
    %239 = arith.mulf %223, %231 : vector<8x32xf32>
    %240 = arith.addf %238, %239 : vector<8x32xf32>
    %241 = math.tanh %240 : vector<8x32xf32>
    %242 = arith.mulf %237, %241 : vector<8x32xf32>
    %c6_77 = arith.constant 6 : index
    %c0_78 = arith.constant 0 : index
    %c0_79 = arith.constant 0 : index
    %243 = vector.load %arg6[%c6_77, %c0_78, %c0_79] : memref<8x8x32xf32, #tpu.memory_space<vmem>>, vector<1x8x32xf32>
    %244 = vector.shape_cast %243 : vector<1x8x32xf32> to vector<8x32xf32>
    %245 = vector.shape_cast %242 : vector<8x32xf32> to vector<1x8x32xf32>
    tpu.vector_store %arg6[%c6_77, %c0_78, %c0_79], %245 {strides = array<i32>} : memref<8x8x32xf32, #tpu.memory_space<vmem>>, vector<1x8x32xf32>,
    %c7 = arith.constant 7 : index
    %c0_80 = arith.constant 0 : index
    %c0_81 = arith.constant 0 : index
    %246 = vector.load %arg9[%c7, %c0_80, %c0_81] : memref<8x8x128xf32, #tpu.memory_space<vmem>>, vector<1x8x128xf32>
    %247 = vector.shape_cast %246 : vector<1x8x128xf32> to vector<8x128xf32>
    %248 = arith.truncf %242 : vector<8x32xf32> to vector<8x32xbf16>
    %cst_82 = arith.constant dense<0.000000e+00> : vector<8x128xf32>
    %249 = tpu.matmul %248, %12, %cst_82 {dimension_numbers = #tpu.dot_dimension_numbers<[1], [0], [0], [1], [0, 0, 1, 1], [], []>} : vector<8x32xbf16>, vector<32x128xbf16>, vector<8x128xf32> -> vector<8x128xf32>
    %250 = arith.addf %247, %249 : vector<8x128xf32>
    %251 = vector.extract_strided_slice %250 {offsets = [0, 0], sizes = [8, 32], strides = [1, 1]} : vector<8x128xf32> to vector<8x32xf32>
    %252 = arith.negf %251 : vector<8x32xf32>
    %253 = math.exp %252 : vector<8x32xf32>
    %cst_83 = arith.constant 1.000000e+00 : f32
    %254 = vector.broadcast %cst_83 : f32 to vector<8x32xf32>
    %255 = arith.addf %254, %253 : vector<8x32xf32>
    %256 = arith.divf %254, %255 : vector<8x32xf32>
    %257 = vector.extract_strided_slice %250 {offsets = [0, 32], sizes = [8, 32], strides = [1, 1]} : vector<8x128xf32> to vector<8x32xf32>
    %258 = arith.negf %257 : vector<8x32xf32>
    %259 = math.exp %258 : vector<8x32xf32>
    %cst_84 = arith.constant 1.000000e+00 : f32
    %260 = vector.broadcast %cst_84 : f32 to vector<8x32xf32>
    %261 = arith.addf %260, %259 : vector<8x32xf32>
    %262 = arith.divf %260, %261 : vector<8x32xf32>
    %263 = vector.extract_strided_slice %250 {offsets = [0, 64], sizes = [8, 32], strides = [1, 1]} : vector<8x128xf32> to vector<8x32xf32>
    %264 = math.tanh %263 : vector<8x32xf32>
    %265 = vector.extract_strided_slice %250 {offsets = [0, 96], sizes = [8, 32], strides = [1, 1]} : vector<8x128xf32> to vector<8x32xf32>
    %266 = arith.negf %265 : vector<8x32xf32>
    %267 = math.exp %266 : vector<8x32xf32>
    %cst_85 = arith.constant 1.000000e+00 : f32
    %268 = vector.broadcast %cst_85 : f32 to vector<8x32xf32>
    %269 = arith.addf %268, %267 : vector<8x32xf32>
    %270 = arith.divf %268, %269 : vector<8x32xf32>
    %271 = arith.mulf %262, %240 : vector<8x32xf32>
    %272 = arith.mulf %256, %264 : vector<8x32xf32>
    %273 = arith.addf %271, %272 : vector<8x32xf32>
    %274 = math.tanh %273 : vector<8x32xf32>
    %275 = arith.mulf %270, %274 : vector<8x32xf32>
    %c7_86 = arith.constant 7 : index
    %c0_87 = arith.constant 0 : index
    %c0_88 = arith.constant 0 : index
    %276 = vector.load %arg6[%c7_86, %c0_87, %c0_88] : memref<8x8x32xf32, #tpu.memory_space<vmem>>, vector<1x8x32xf32>
    %277 = vector.shape_cast %276 : vector<1x8x32xf32> to vector<8x32xf32>
    %278 = vector.shape_cast %275 : vector<8x32xf32> to vector<1x8x32xf32>
    tpu.vector_store %arg6[%c7_86, %c0_87, %c0_88], %278 {strides = array<i32>} : memref<8x8x32xf32, #tpu.memory_space<vmem>>, vector<1x8x32xf32>,
    %c0_89 = arith.constant 0 : index
    %c0_90 = arith.constant 0 : index
    %279 = vector.load %arg7[%c0_89, %c0_90] : memref<8x32xf32, #tpu.memory_space<vmem>>, vector<8x32xf32>
    tpu.vector_store %arg7[%c0_89, %c0_90], %275 {strides = array<i32>} : memref<8x32xf32, #tpu.memory_space<vmem>>, vector<8x32xf32>,
    %c0_91 = arith.constant 0 : index
    %c0_92 = arith.constant 0 : index
    %280 = vector.load %arg8[%c0_91, %c0_92] : memref<8x32xf32, #tpu.memory_space<vmem>>, vector<8x32xf32>
    tpu.vector_store %arg8[%c0_91, %c0_92], %273 {strides = array<i32>} : memref<8x32xf32, #tpu.memory_space<vmem>>, vector<8x32xf32>,
    return
  }
  func.func @transform_0(%arg0: i32, %arg1: i32) -> (i32, i32, i32) {
    %c0_i32 = arith.constant 0 : i32
    %c0_i32_0 = arith.constant 0 : i32
    return %arg1, %arg0, %c0_i32 : i32, i32, i32
  }
  func.func @transform_1(%arg0: i32, %arg1: i32) -> (i32, i32) {
    %c0_i32 = arith.constant 0 : i32
    %c0_i32_0 = arith.constant 0 : i32
    %c0_i32_1 = arith.constant 0 : i32
    return %c0_i32, %c0_i32_0 : i32, i32
  }
  func.func @transform_2(%arg0: i32, %arg1: i32) -> (i32, i32) {
    %c0_i32 = arith.constant 0 : i32
    %c0_i32_0 = arith.constant 0 : i32
    %c0_i32_1 = arith.constant 0 : i32
    return %c0_i32, %c0_i32_0 : i32, i32
  }
  func.func @transform_3(%arg0: i32, %arg1: i32) -> (i32, i32) {
    %c0_i32 = arith.constant 0 : i32
    %c0_i32_0 = arith.constant 0 : i32
    %c0_i32_1 = arith.constant 0 : i32
    return %c0_i32, %c0_i32_0 : i32, i32
  }
  func.func @transform_4(%arg0: i32, %arg1: i32) -> (i32, i32, i32) {
    %c0_i32 = arith.constant 0 : i32
    %c0_i32_0 = arith.constant 0 : i32
    return %arg1, %arg0, %c0_i32 : i32, i32, i32
  }
  func.func @transform_5(%arg0: i32, %arg1: i32) -> (i32, i32) {
    %c0_i32 = arith.constant 0 : i32
    %c0_i32_0 = arith.constant 0 : i32
    return %arg0, %c0_i32 : i32, i32
  }
  func.func @transform_6(%arg0: i32, %arg1: i32) -> (i32, i32) {
    %c0_i32 = arith.constant 0 : i32
    %c0_i32_0 = arith.constant 0 : i32
    return %arg0, %c0_i32 : i32, i32
  }
}

</mosaic_0001>

<bundles_post_ra>
// kernel: encoder_lstm_forward.1
= control target key start
LH: loop header
LB: loop body
LE: loop exit
PB: predicated region body
PF: predicated region fallthrough
CT: control target
= control target key end

     0   :  { %vm25_vm0 = vcmask 261120   ;;  %v1047_v0 = vmov 0.0   ;;  %vm1048_vm1 = vmmov 0   ;;  %vm71_vm2 = vcmask 130048   ;;  %s1049_s13 = smov 64   ;;  %s1050_s15 = smov 32   ;;  %s1329_s1 = inlined_call_operand.vmem [shape: bf16[16,128], index: 1, kind: input, shape index: {}]   ;;  %s1330_s3 = inlined_call_operand.vmem [shape: bf16[32,128], index: 3, kind: input, shape index: {}]   ;;  %s1331_s0 = inlined_call_operand.vmem [shape: bf16[8,8,16], index: 0, kind: input, shape index: {}]   ;;  %s1332_s5 = inlined_call_operand.vmem [shape: f32[8,32], index: 5, kind: output, shape index: {1}]   ;;  %s1333_s6 = inlined_call_operand.vmem [shape: f32[8,32], index: 6, kind: output, shape index: {2}]   ;;  %s1334_s2 = inlined_call_operand.vmem [shape: f32[1,128], index: 2, kind: input, shape index: {}]   ;;  %s1335_s4 = inlined_call_operand.vmem [shape: f32[8,8,32], index: 4, kind: output, shape index: {0}]  }
   0x1   :  { %907 = vmatprep.subr.bf16.mxu1 %v1047_v0  ;;  %v976_v1 = vld [vmem:[%s1329_s1] sm:$0xff]   ;;  %911 = vmatprep.mubr.msk.bf16.mxu1 %vm1048_vm1, %v1047_v0  ;;  %26 = vst.msk [vmem:[%s1332_s5] sm:$0xff] %vm25_vm0, %v1047_v0  ;;  %v979_v4 = vld [vmem:[%s1331_s0 + $0x8] sm:$0xff]   ;;  %27 = vst.msk [vmem:[%s1333_s6] sm:$0xff] %vm25_vm0, %v1047_v0 }
   0x2   :  { %v1101_v2 = vld [vmem:[%s1330_s3] sm:$0xff]   ;;  %897 = vmatprep.subr.bf16.mxu0 %v976_v1  ;;  %v1115_v5 = vld [vmem:[%s1330_s3 + $0x8] sm:$0xff]   ;;  %v981_v52 = vld [vmem:[%s1331_s0 + $0x10] sm:$0xff]  }
   0x3   :  { %v978_v3 = vld [vmem:[%s1331_s0] sm:$0xff]   ;;  %908 = vmatpush3.bf16.msra.mxu1 %v1101_v2  ;;  %898 = vmatpush3.bf16.msra.mxu0 %v976_v1  ;;  %v982_v53 = vld [vmem:[%s1331_s0 + $0x18] sm:$0xff]   ;;  %s1051_s0 = smov 96  }
   0x4   :  { %899 = vmatprep.mubr.msk.bf16.mxu0 %vm71_vm2, %v978_v3  ;;  %909 = vmatprep.subr.bf16.mxu1 %v1047_v0  ;;  %v1143_v8 = vld [vmem:[%s1334_s2] ss:$0 sm:$0xff] }
   0x5   :  { %923 = vmatprep.subr.bf16.mxu0 %v1047_v0 }
   0x6   :  { %900 = vmatmul.mubr.msk.bf16.vlgmr.msra.gmra.mrb[0].mxu0 %vm71_vm2, %v979_v4 }
   0x7   :  { %910 = vmatpush3.bf16.msra.mxu1 %v1115_v5  ;;  %924 = vmatpush3.bf16.msra.mxu0 %v1101_v2 }
   0x8   :  { %v161_v6 = vld [vmem:[%s1332_s5] sm:$0xff]  ;;  %915 = vmatprep.subr.bf16.mxu1 %v1047_v0  ;;  %925 = vmatprep.subr.bf16.mxu0 %v1047_v0 }
   0x9   :  { %v164_v7 = vpack.c.bf16 %v161_v6, %v161_v6  ;;  %v162_v20 = vld [vmem:[%s1333_s6] sm:$0xff]  ;;  %903 = vmatprep.mubr.msk.bf16.mxu0 %vm71_vm2, %v981_v52 }
   0xb   :  { %912 = vmatmul.mubr.msk.bf16.vlgmr.msra.gmra.mrb[0].mxu1 %vm25_vm0, %v164_v7  ;;  %926 = vmatpush3.bf16.msra.mxu0 %v1115_v5 }
   0xc   :  { %916 = vmatpush3.bf16.msra.mxu1 %v1101_v2  ;;  %919 = vmatprep.mubr.msk.bf16.mxu1 %vm1048_vm1, %v1047_v0 }
   0xd   :  { %917 = vmatprep.subr.bf16.mxu1 %v1047_v0  ;;  %939 = vmatprep.subr.bf16.mxu0 %v1047_v0 }
   0xe   :  { %904 = vmatmul.mubr.msk.bf16.gmra.mrb[4].mxu0 %vm71_vm2, %v982_v53 }
   0xf   :  { %927 = vmatprep.mubr.msk.bf16.mxu0 %vm1048_vm1, %v1047_v0 }
  0x10   :  { %918 = vmatpush3.bf16.msra.mxu1 %v1115_v5 }
  0x11   :  { %931 = vmatprep.subr.bf16.mxu1 %v1047_v0 }
  0xd9   :  { %v1145_v9 = vpop.f32.mrb[0].mxu0 }
  0xda   :  { %v118_v10 = vpop.f32.mrb[1].mxu0  ;;  %v127_v63 = vadd.f32 %v1145_v9, %v1143_v8 }
  0xdb   :  { %v119_v11 = vadd.f32 %v1143_v8, %v118_v10  ;;  %v1148_v12 = vpop.f32.mrb[2].mxu0 }
  0xdc   :  { %v121_v13 = vpop.f32.mrb[3].mxu0 }
  0xdd   :  { %v122_v36 = vadd.f32 %v1143_v8, %v121_v13 }
  0xde   :  { %v215_v14 = vpop.f32.mrb[0].mxu1 }
  0xdf   :  { %v221_v15 = vadd.f32 %v215_v14, %v119_v11  ;;  %v913_v16 = vpop.f32.mrb[1].mxu1 }
  0xe0   :  { %v218_v17 = vpop.f32.mrb[2].mxu1 }
  0xe1   :  { %983 = vtanh.f32 %v221_v15  ;;  %v914_v18 = vpop.f32.mrb[3].mxu1  ;;  %v846_v21 = vmul.f32 -1.442695, %v221_v15  ;;  %v1188_v58 = vpop.f32.mrb[4].mxu0 }
  0xe2   :  { %v1190_v59 = vpop.f32.mrb[5].mxu0 }
  0xe3   :  { %985 = vpow2.f32 %v846_v21  ;;  %v1192_v60 = vpop.f32.mrb[6].mxu0 }
  0xe4   :  { %v1194_v61 = vpop.f32.mrb[7].mxu0 }
  0xeb   :  { %v984_v19 = vpop.eup %983 }
  0xec   :  { %235 = vrot.lane.b32.xlu0 %v984_v19, %s1049_s13 }
  0xed   :  { %v986_v22 = vpop.eup %985 }
  0xee   :  { %v225_v23 = vadd.f32 1.0, %v986_v22 }
  0xf0   :  { %230 = vrot.lane.b32.xlu0 %v162_v20, %s1050_s15  ;;  %987 = vrcp.f32 %v225_v23 }
  0xfa   :  { %v988_v24 = vpop.eup %987 }
 0x15e   :  { %v236_v25 = vpop.permute.xlu0 %235 }
 0x15f   :  { %v238_v26 = vmul.f32 %v988_v24, %v236_v25  ;;  %v130_v25 = vadd.f32 %v1148_v12, %v1143_v8 }
 0x161   :  { %240 = vrot.lane.b32.xlu1 %v238_v26, %s1050_s15 }
 0x162   :  { %v231_v27 = vpop.permute.xlu0 %230 }
 0x163   :  { %v233_v28 = vmul.f32 %v988_v24, %v231_v27 }
 0x1d3   :  { %v241_v29 = vpop.permute.xlu1 %240 }
 0x1d4   :  { %v243_v30 = vadd.f32 %v241_v29, %v233_v28 }
 0x1d6   :  { %989 = vtanh.f32 %v243_v30 }
 0x1e0   :  { %v990_v31 = vpop.eup %989 }
 0x1e1   :  { %246 = vrot.lane.b32.xlu1 %v990_v31, %s1049_s13 }
 0x253   :  { %v247_v32 = vpop.permute.xlu1 %246 }
 0x254   :  { %v1157_v33 = vmul.f32 %v988_v24, %v247_v32 }
 0x256   :  { %v257_v34 = vpack.c.bf16 %v1157_v33, %v1157_v33 }
 0x258   :  { %259 = vrot.lane.b32.xlu0 %v257_v34, %s1050_s15 }
 0x2ca   :  { %v260_v35 = vpop.permute.xlu0 %259 }
 0x2cb   :  { %920 = vmatmul.mubr.msk.bf16.vlgmr.msra.gmra.mrb[4].mxu1 %vm25_vm0, %v260_v35 }
 0x2cc   :  { %932 = vmatpush3.bf16.msra.mxu1 %v1101_v2  ;;  %935 = vmatprep.mubr.msk.bf16.mxu1 %vm1048_vm1, %v1047_v0 }
 0x2cd   :  { %933 = vmatprep.subr.bf16.mxu1 %v1047_v0 }
 0x2d0   :  { %934 = vmatpush3.bf16.msra.mxu1 %v1115_v5 }
 0x2d1   :  { %947 = vmatprep.subr.bf16.mxu1 %v1047_v0 }
 0x39e   :  { %v298_v37 = vpop.f32.mrb[4].mxu1 }
 0x39f   :  { %v304_v38 = vadd.f32 %v298_v37, %v122_v36  ;;  %v921_v39 = vpop.f32.mrb[5].mxu1 }
 0x3a0   :  { %v301_v40 = vpop.f32.mrb[6].mxu1 }
 0x3a1   :  { %991 = vtanh.f32 %v304_v38  ;;  %v922_v41 = vpop.f32.mrb[7].mxu1  ;;  %v848_v43 = vmul.f32 -1.442695, %v304_v38 }
 0x3a3   :  { %993 = vpow2.f32 %v848_v43 }
 0x3ab   :  { %v992_v42 = vpop.eup %991 }
 0x3ac   :  { %314 = vrot.lane.b32.xlu1 %v992_v42, %s1049_s13 }
 0x3ad   :  { %v994_v44 = vpop.eup %993 }
 0x3ae   :  { %v308_v45 = vadd.f32 1.0, %v994_v44 }
 0x3b0   :  { %995 = vrcp.f32 %v308_v45 }
 0x3ba   :  { %v996_v46 = vpop.eup %995 }
 0x3bb   :  { %v312_v49 = vmul.f32 %v996_v46, %v243_v30 }
 0x41e   :  { %v315_v47 = vpop.permute.xlu1 %314 }
 0x41f   :  { %v317_v48 = vmul.f32 %v996_v46, %v315_v47 }
 0x421   :  { %319 = vrot.lane.b32.xlu0 %v317_v48, %s1050_s15 }
 0x493   :  { %v320_v50 = vpop.permute.xlu0 %319 }
 0x494   :  { %v322_v51 = vadd.f32 %v320_v50, %v312_v49 }
 0x496   :  { %997 = vtanh.f32 %v322_v51 }
 0x4a0   :  { %v998_v54 = vpop.eup %997 }
 0x4a1   :  { %325 = vrot.lane.b32.xlu1 %v998_v54, %s1049_s13 }
 0x513   :  { %v326_v55 = vpop.permute.xlu1 %325 }
 0x514   :  { %v1183_v56 = vmul.f32 %v996_v46, %v326_v55  ;;  %v135_v46 = vadd.f32 %v1143_v8, %v1190_v59 }
 0x516   :  { %v337_v57 = vpack.c.bf16 %v1183_v56, %v1183_v56 }
 0x518   :  { %339 = vrot.lane.b32.xlu0 %v337_v57, %s1050_s15 }
 0x58a   :  { %v340_v62 = vpop.permute.xlu0 %339 }
 0x58b   :  { %928 = vmatmul.mubr.msk.bf16.vlgmr.msra.gmra.mrb[8].mxu0 %vm25_vm0, %v340_v62 }
 0x58c   :  { %940 = vmatpush3.bf16.msra.mxu0 %v1101_v2  ;;  %943 = vmatprep.mubr.msk.bf16.mxu0 %vm1048_vm1, %v1047_v0 }
 0x58d   :  { %941 = vmatprep.subr.bf16.mxu0 %v1047_v0 }
 0x590   :  { %942 = vmatpush3.bf16.msra.mxu0 %v1115_v5 }
 0x591   :  { %955 = vmatprep.subr.bf16.mxu0 %v1047_v0 }
 0x65e   :  { %v378_v1 = vpop.f32.mrb[8].mxu0 }
 0x65f   :  { %v384_v3 = vadd.f32 %v378_v1, %v127_v63  ;;  %v929_v4 = vpop.f32.mrb[9].mxu0 }
 0x660   :  { %v381_v6 = vpop.f32.mrb[10].mxu0 }
 0x661   :  { %999 = vtanh.f32 %v384_v3  ;;  %v930_v7 = vpop.f32.mrb[11].mxu0  ;;  %v851_v11 = vmul.f32 -1.442695, %v384_v3 }
 0x663   :  { %1001 = vpow2.f32 %v851_v11 }
 0x66b   :  { %v1000_v10 = vpop.eup %999 }
 0x66c   :  { %394 = vrot.lane.b32.xlu1 %v1000_v10, %s1049_s13 }
 0x66d   :  { %v1002_v13 = vpop.eup %1001 }
 0x66e   :  { %v388_v14 = vadd.f32 1.0, %v1002_v13  ;;  %v138_v13 = vadd.f32 %v1143_v8, %v1194_v61 }
 0x670   :  { %1003 = vrcp.f32 %v388_v14 }
 0x67a   :  { %v1004_v15 = vpop.eup %1003 }
 0x67b   :  { %v392_v9 = vmul.f32 %v1004_v15, %v322_v51 }
 0x6de   :  { %v395_v16 = vpop.permute.xlu1 %394 }
 0x6df   :  { %v397_v17 = vmul.f32 %v1004_v15, %v395_v16 }
 0x6e1   :  { %399 = vrot.lane.b32.xlu0 %v397_v17, %s1050_s15 }
 0x753   :  { %v400_v18 = vpop.permute.xlu0 %399 }
 0x754   :  { %v402_v19 = vadd.f32 %v400_v18, %v392_v9 }
 0x756   :  { %1005 = vtanh.f32 %v402_v19 }
 0x760   :  { %v1006_v20 = vpop.eup %1005 }
 0x761   :  { %405 = vrot.lane.b32.xlu1 %v1006_v20, %s1049_s13 }
 0x7d3   :  { %v406_v21 = vpop.permute.xlu1 %405 }
 0x7d4   :  { %v1208_v22 = vmul.f32 %v1004_v15, %v406_v21 }
 0x7d6   :  { %v417_v23 = vpack.c.bf16 %v1208_v22, %v1208_v22 }
 0x7d8   :  { %419 = vrot.lane.b32.xlu0 %v417_v23, %s1050_s15 }
 0x84a   :  { %v420_v24 = vpop.permute.xlu0 %419 }
 0x84b   :  { %936 = vmatmul.mubr.msk.bf16.vlgmr.msra.gmra.mrb[8].mxu1 %vm25_vm0, %v420_v24 }
 0x84c   :  { %948 = vmatpush3.bf16.msra.mxu1 %v1101_v2  ;;  %951 = vmatprep.mubr.msk.bf16.mxu1 %vm1048_vm1, %v1047_v0 }
 0x84d   :  { %949 = vmatprep.subr.bf16.mxu1 %v1047_v0 }
 0x850   :  { %950 = vmatpush3.bf16.msra.mxu1 %v1115_v5 }
 0x851   :  { %963 = vmatprep.subr.bf16.mxu1 %v1047_v0 }
 0x91e   :  { %v458_v26 = vpop.f32.mrb[8].mxu1 }
 0x91f   :  { %v464_v27 = vadd.f32 %v458_v26, %v130_v25  ;;  %v937_v28 = vpop.f32.mrb[9].mxu1 }
 0x920   :  { %v461_v29 = vpop.f32.mrb[10].mxu1 }
 0x921   :  { %1007 = vtanh.f32 %v464_v27  ;;  %v938_v30 = vpop.f32.mrb[11].mxu1  ;;  %v854_v32 = vmul.f32 -1.442695, %v464_v27 }
 0x922   :  { %v143_v30 = vadd.f32 %v1188_v58, %v1143_v8 }
 0x923   :  { %1009 = vpow2.f32 %v854_v32 }
 0x92b   :  { %v1008_v31 = vpop.eup %1007 }
 0x92c   :  { %474 = vrot.lane.b32.xlu1 %v1008_v31, %s1049_s13 }
 0x92d   :  { %v1010_v34 = vpop.eup %1009 }
 0x92e   :  { %v468_v35 = vadd.f32 1.0, %v1010_v34 }
 0x930   :  { %1011 = vrcp.f32 %v468_v35 }
 0x93a   :  { %v1012_v36 = vpop.eup %1011 }
 0x93b   :  { %v472_v12 = vmul.f32 %v1012_v36, %v402_v19 }
 0x99e   :  { %v475_v37 = vpop.permute.xlu1 %474 }
 0x99f   :  { %v477_v38 = vmul.f32 %v1012_v36, %v475_v37 }
 0x9a1   :  { %479 = vrot.lane.b32.xlu0 %v477_v38, %s1050_s15 }
 0xa13   :  { %v480_v39 = vpop.permute.xlu0 %479 }
 0xa14   :  { %v482_v40 = vadd.f32 %v480_v39, %v472_v12 }
 0xa16   :  { %1013 = vtanh.f32 %v482_v40 }
 0xa20   :  { %v1014_v41 = vpop.eup %1013 }
 0xa21   :  { %485 = vrot.lane.b32.xlu1 %v1014_v41, %s1049_s13 }
 0xa93   :  { %v486_v42 = vpop.permute.xlu1 %485 }
 0xa94   :  { %v1225_v43 = vmul.f32 %v1012_v36, %v486_v42 }
 0xa96   :  { %v497_v44 = vpack.c.bf16 %v1225_v43, %v1225_v43 }
 0xa98   :  { %499 = vrot.lane.b32.xlu0 %v497_v44, %s1050_s15 }
 0xb0a   :  { %v500_v45 = vpop.permute.xlu0 %499 }
 0xb0b   :  { %944 = vmatmul.mubr.msk.bf16.vlgmr.msra.gmra.mrb[12].mxu0 %vm25_vm0, %v500_v45 }
 0xb0c   :  { %956 = vmatpush3.bf16.msra.mxu0 %v1101_v2  ;;  %959 = vmatprep.mubr.msk.bf16.mxu0 %vm1048_vm1, %v1047_v0 }
 0xb0d   :  { %957 = vmatprep.subr.bf16.mxu0 %v1047_v0 }
 0xb10   :  { %958 = vmatpush3.bf16.msra.mxu0 %v1115_v5 }
 0xbde   :  { %v538_v47 = vpop.f32.mrb[12].mxu0 }
 0xbdf   :  { %v544_v48 = vadd.f32 %v538_v47, %v135_v46  ;;  %v945_v49 = vpop.f32.mrb[13].mxu0 }
 0xbe0   :  { %v541_v50 = vpop.f32.mrb[14].mxu0 }
 0xbe1   :  { %1015 = vtanh.f32 %v544_v48  ;;  %v946_v51 = vpop.f32.mrb[15].mxu0  ;;  %v857_v53 = vmul.f32 -1.442695, %v544_v48 }
 0xbe2   :  { %v146_v51 = vadd.f32 %v1192_v60, %v1143_v8 }
 0xbe3   :  { %1017 = vpow2.f32 %v857_v53 }
 0xbeb   :  { %v1016_v52 = vpop.eup %1015 }
 0xbec   :  { %554 = vrot.lane.b32.xlu1 %v1016_v52, %s1049_s13 }
 0xbed   :  { %v1018_v54 = vpop.eup %1017 }
 0xbee   :  { %v548_v55 = vadd.f32 1.0, %v1018_v54 }
 0xbf0   :  { %1019 = vrcp.f32 %v548_v55 }
 0xbfa   :  { %v1020_v57 = vpop.eup %1019 }
 0xbfb   :  { %v552_v59 = vmul.f32 %v1020_v57, %v482_v40 }
 0xc5e   :  { %v555_v62 = vpop.permute.xlu1 %554 }
 0xc5f   :  { %v557_v63 = vmul.f32 %v1020_v57, %v555_v62 }
 0xc61   :  { %559 = vrot.lane.b32.xlu0 %v557_v63, %s1050_s15 }
 0xcd3   :  { %v560_v1 = vpop.permute.xlu0 %559 }
 0xcd4   :  { %v562_v3 = vadd.f32 %v560_v1, %v552_v59 }
 0xcd6   :  { %1021 = vtanh.f32 %v562_v3 }
 0xce0   :  { %v1022_v4 = vpop.eup %1021 }
 0xce1   :  { %565 = vrot.lane.b32.xlu1 %v1022_v4, %s1049_s13 }
 0xd53   :  { %v566_v6 = vpop.permute.xlu1 %565 }
 0xd54   :  { %v1241_v7 = vmul.f32 %v1020_v57, %v566_v6 }
 0xd56   :  { %v577_v10 = vpack.c.bf16 %v1241_v7, %v1241_v7 }
 0xd58   :  { %579 = vrot.lane.b32.xlu0 %v577_v10, %s1050_s15 }
 0xdca   :  { %v580_v11 = vpop.permute.xlu0 %579 }
 0xdcb   :  { %952 = vmatmul.mubr.msk.bf16.vlgmr.msra.gmra.mrb[12].mxu1 %vm25_vm0, %v580_v11 }
 0xdcc   :  { %964 = vmatpush3.bf16.msra.mxu1 %v1101_v2  ;;  %967 = vmatprep.mubr.msk.bf16.mxu1 %vm1048_vm1, %v1047_v0 }
 0xdcd   :  { %965 = vmatprep.subr.bf16.mxu1 %v1047_v0 }
 0xdd0   :  { %966 = vmatpush3.bf16.msra.mxu1 %v1115_v5 }
 0xe9e   :  { %v618_v14 = vpop.f32.mrb[12].mxu1 }
 0xe9f   :  { %v624_v15 = vadd.f32 %v618_v14, %v138_v13  ;;  %v953_v16 = vpop.f32.mrb[13].mxu1 }
 0xea0   :  { %v621_v17 = vpop.f32.mrb[14].mxu1 }
 0xea1   :  { %1023 = vtanh.f32 %v624_v15  ;;  %v954_v9 = vpop.f32.mrb[15].mxu1  ;;  %v860_v2 = vmul.f32 -1.442695, %v624_v15 }
 0xea3   :  { %1025 = vpow2.f32 %v860_v2 }
 0xeab   :  { %v1024_v18 = vpop.eup %1023 }
 0xeac   :  { %634 = vrot.lane.b32.xlu1 %v1024_v18, %s1049_s13 }
 0xead   :  { %v1026_v19 = vpop.eup %1025 }
 0xeae   :  { %v628_v20 = vadd.f32 1.0, %v1026_v19 }
 0xeb0   :  { %1027 = vrcp.f32 %v628_v20 }
 0xeba   :  { %v1028_v0 = vpop.eup %1027 }
 0xebb   :  { %v632_v61 = vmul.f32 %v1028_v0, %v562_v3 }
 0xf1e   :  { %v635_v21 = vpop.permute.xlu1 %634 }
 0xf1f   :  { %v637_v5 = vmul.f32 %v1028_v0, %v635_v21 }
 0xf21   :  { %639 = vrot.lane.b32.xlu0 %v637_v5, %s1050_s15 }
 0xf93   :  { %v640_v23 = vpop.permute.xlu0 %639 }
 0xf94   :  { %v642_v24 = vadd.f32 %v640_v23, %v632_v61 }
 0xf96   :  { %1029 = vtanh.f32 %v642_v24 }
 0xfa0   :  { %v1030_v25 = vpop.eup %1029 }
 0xfa1   :  { %645 = vrot.lane.b32.xlu1 %v1030_v25, %s1049_s13 }
0x1013   :  { %v646_v26 = vpop.permute.xlu1 %645 }
0x1014   :  { %v1257_v27 = vmul.f32 %v1028_v0, %v646_v26 }
0x1016   :  { %v657_v28 = vpack.c.bf16 %v1257_v27, %v1257_v27 }
0x1018   :  { %659 = vrot.lane.b32.xlu0 %v657_v28, %s1050_s15 }
0x108a   :  { %v660_v29 = vpop.permute.xlu0 %659 }
0x108b   :  { %960 = vmatmul.mubr.msk.bf16.vlgmr.msra.gmra.mrb[16].mxu0 %vm25_vm0, %v660_v29 }
0x115e   :  { %v698_v31 = vpop.f32.mrb[16].mxu0 }
0x115f   :  { %v704_v32 = vadd.f32 %v698_v31, %v143_v30  ;;  %v961_v34 = vpop.f32.mrb[17].mxu0 }
0x1160   :  { %v701_v35 = vpop.f32.mrb[18].mxu0 }
0x1161   :  { %1031 = vtanh.f32 %v704_v32  ;;  %v962_v36 = vpop.f32.mrb[19].mxu0  ;;  %v863_v38 = vmul.f32 -1.442695, %v704_v32 }
0x1163   :  { %1033 = vpow2.f32 %v863_v38 }
0x116b   :  { %v1032_v37 = vpop.eup %1031 }
0x116c   :  { %714 = vrot.lane.b32.xlu1 %v1032_v37, %s1049_s13 }
0x116d   :  { %v1034_v12 = vpop.eup %1033 }
0x116e   :  { %v708_v39 = vadd.f32 1.0, %v1034_v12 }
0x1170   :  { %1035 = vrcp.f32 %v708_v39 }
0x117a   :  { %v1036_v40 = vpop.eup %1035 }
0x117b   :  { %v712_v58 = vmul.f32 %v1036_v40, %v642_v24 }
0x11de   :  { %v715_v41 = vpop.permute.xlu1 %714 }
0x11df   :  { %v717_v42 = vmul.f32 %v1036_v40, %v715_v41 }
0x11e1   :  { %719 = vrot.lane.b32.xlu0 %v717_v42, %s1050_s15 }
0x1253   :  { %v720_v44 = vpop.permute.xlu0 %719 }
0x1254   :  { %v722_v45 = vadd.f32 %v720_v44, %v712_v58 }
0x1256   :  { %1037 = vtanh.f32 %v722_v45 }
0x1260   :  { %v1038_v46 = vpop.eup %1037 }
0x1261   :  { %725 = vrot.lane.b32.xlu1 %v1038_v46, %s1049_s13 }
0x12d3   :  { %v726_v47 = vpop.permute.xlu1 %725 }
0x12d4   :  { %v728_v48 = vmul.f32 %v1036_v40, %v726_v47 }
0x12d6   :  { %v737_v49 = vpack.c.bf16 %v728_v48, %v728_v48 }
0x12d8   :  { %739 = vrot.lane.b32.xlu0 %v737_v49, %s1050_s15 }
0x134a   :  { %v740_v50 = vpop.permute.xlu0 %739 }
0x134b   :  { %968 = vmatmul.mubr.msk.bf16.vlgmr.msra.gmra.mrb[16].mxu1 %vm25_vm0, %v740_v50 }
0x141e   :  { %v778_v52 = vpop.f32.mrb[16].mxu1 }
0x141f   :  { %v784_v53 = vadd.f32 %v778_v52, %v146_v51  ;;  %v969_v54 = vpop.f32.mrb[17].mxu1 }
0x1420   :  { %v781_v55 = vpop.f32.mrb[18].mxu1 }
0x1421   :  { %1039 = vtanh.f32 %v784_v53  ;;  %v970_v57 = vpop.f32.mrb[19].mxu1  ;;  %v866_v63 = vmul.f32 -1.442695, %v784_v53 }
0x1423   :  { %1041 = vpow2.f32 %v866_v63 }
0x142b   :  { %v1040_v62 = vpop.eup %1039 }
0x142c   :  { %794 = vrot.lane.b32.xlu1 %v1040_v62, %s1049_s13 }
0x142d   :  { %v1042_v59 = vpop.eup %1041 }
0x142e   :  { %v788_v1 = vadd.f32 1.0, %v1042_v59 }
0x1430   :  { %1043 = vrcp.f32 %v788_v1 }
0x143a   :  { %v1044_v3 = vpop.eup %1043 }
0x143b   :  { %v792_v8 = vmul.f32 %v1044_v3, %v722_v45 }
0x149e   :  { %v795_v4 = vpop.permute.xlu1 %794 }
0x149f   :  { %v797_v6 = vmul.f32 %v1044_v3, %v795_v4 }
0x14a1   :  { %799 = vrot.lane.b32.xlu0 %v797_v6, %s1050_s15 }
0x14a5   :  { %251 = vrot.lane.b32.xlu0 %v1157_v33, %s1050_s15 }
0x14a9   :  { %410 = vrot.lane.b32.xlu0 %v1208_v22, %s1050_s15 }
0x14ad   :  { %570 = vrot.lane.b32.xlu0 %v1241_v7, %s1050_s15 }
0x14b1   :  { %730 = vrot.lane.b32.xlu0 %v728_v48, %s1050_s15 }
0x1513   :  { %v800_v60 = vpop.permute.xlu0 %799 }
0x1514   :  { %v802_v10 = vadd.f32 %v800_v60, %v792_v8 }
0x1516   :  { %1045 = vtanh.f32 %v802_v10  ;;  %817 = vrot.lane.b32.xlu0 %v802_v10, %s1051_s0 }
0x1517   :  { %v252_v11 = vpop.permute.xlu0 %251 }
0x1518   :  { %254 = vst.msk [vmem:[%s1335_s4] sm:$0xff] %vm25_vm0, %v252_v11 }
0x151b   :  { %v411_v33 = vpop.permute.xlu0 %410 }
0x151c   :  { %852 = vst.msk [vmem:[%s1335_s4 + $0x10] sm:$0xff] %vm25_vm0, %v411_v33 }
0x151f   :  { %v571_v22 = vpop.permute.xlu0 %570 }
0x1520   :  { %v1046_v7 = vpop.eup %1045  ;;  %858 = vst.msk [vmem:[%s1335_s4 + $0x20] sm:$0xff] %vm25_vm0, %v571_v22 }
0x1521   :  { %805 = vrot.lane.b32.xlu1 %v1046_v7, %s1049_s13 }
0x1523   :  { %v731_v13 = vpop.permute.xlu0 %730 }
0x1524   :  { %864 = vst.msk [vmem:[%s1335_s4 + $0x30] sm:$0xff] %vm25_vm0, %v731_v13 }
0x1525   :  { %330 = vrot.lane.b32.xlu1 %v1183_v56, %s1050_s15 }
0x1529   :  { %490 = vrot.lane.b32.xlu1 %v1225_v43, %s1050_s15 }
0x152d   :  { %650 = vrot.lane.b32.xlu1 %v1257_v27, %s1050_s15 }
0x1588   :  { %v818_v14 = vpop.permute.xlu0 %817 }
0x1589   :  { %820 = vst.msk [vmem:[%s1333_s6] sm:$0xff] %vm25_vm0, %v818_v14 }
0x1593   :  { %v806_v15 = vpop.permute.xlu1 %805 }
0x1594   :  { %v808_v16 = vmul.f32 %v1044_v3, %v806_v15 }
0x1596   :  { %810 = vrot.lane.b32.xlu1 %v808_v16, %s1050_s15 }
0x1597   :  { %v331_v17 = vpop.permute.xlu1 %330 }
0x1598   :  { %849 = vst.msk [vmem:[%s1335_s4 + $0x8] sm:$0xff] %vm25_vm0, %v331_v17 }
0x159b   :  { %v491_v56 = vpop.permute.xlu1 %490 }
0x159c   :  { %855 = vst.msk [vmem:[%s1335_s4 + $0x18] sm:$0xff] %vm25_vm0, %v491_v56 }
0x159f   :  { %v651_v43 = vpop.permute.xlu1 %650 }
0x15a0   :  { %861 = vst.msk [vmem:[%s1335_s4 + $0x28] sm:$0xff] %vm25_vm0, %v651_v43 }
0x1608   :  { %v811_v9 = vpop.permute.xlu1 %810 }
0x1609   :  { %867 = vst.msk [vmem:[%s1335_s4 + $0x38] sm:$0xff] %vm25_vm0, %v811_v9  ;;  %815 = vst.msk [vmem:[%s1332_s5] sm:$0xff] %vm25_vm0, %v811_v9 }

</bundles_post_ra>
